<compile_context>
chip_gen: v5e
topology: v5e:2x2
jax: 0.10.0
libtpu: 0.0.40
codegen_flags: <defaults>
</compile_context>

<pallas_src>
import functools

import jax
import jax.numpy as jnp
from jax.experimental import pallas as pl
from jax.experimental.pallas import tpu as pltpu

_LANE = 128        # vreg lane width
_SUBLANE = 8       # f32 sublane count
_NEG_BIG = -1e30   # "minus infinity" for padded classes (finite -> no NaNs)


def _round_up(x, m):
    return (x + m - 1) // m * m


def _sk_log_proba_kernel(xa_ref, wa_ref, o_ref):
    """Per row-tile: logits = x_aug @ W_aug ; out = log_softmax(logits, -1).

    The intercept is folded into the last row of W_aug (x_aug has a trailing
    ones column), so the kernel is a pure MXU matmul + stable log-softmax.
    Padded class columns carry a -1e30 bias and therefore vanish from the LSE.
    """
    logits = jnp.dot(
        xa_ref[...], wa_ref[...], preferred_element_type=jnp.float32
    )                                                    # (tile_m, C_pad) f32
    m = jnp.max(logits, axis=-1, keepdims=True)
    lse = m + jnp.log(jnp.sum(jnp.exp(logits - m), axis=-1, keepdims=True))
    o_ref[...] = (logits - lse).astype(o_ref.dtype)


@functools.partial(jax.jit, static_argnames=("max_tile_m",))
def sk_interface_forward(x, y, w, b, *, max_tile_m=512):
    """Pallas equivalent of SKInterface.forward((x, y)) in eval mode.

    x: [N, F] float32 features
    y: [N]    labels (only consumed by the untranslatable fit() branch)
    w: [F, C] float32 classifier coefficients
    b: [C]    float32 classifier intercept
    returns: [N, C] float32 log-probabilities (rows sum to 1 in prob space)
    """
    del y  # labels are only used by fit()/partial_fit()
    n, f = x.shape
    c = w.shape[1]

    # ---- lane-dense class padding -------------------------------------
    c_pad = _round_up(c, _LANE)

    # ---- row-tile sizing from a VMEM budget (safe on v5e/v6e/v7x) ------
    vmem_budget = 32 * 1024 * 1024              # explicit scoped-VMEM limit
    per_row_bytes = 4 * ((f + 1) + c_pad)       # one row of x tile + out tile
    w_bytes = 4 * (f + 1) * c_pad
    # double-buffered x & out tiles + double-buffered W must fit in ~half budget
    tile_cap = max(_SUBLANE,
                   (vmem_budget // 2 - 2 * w_bytes) // (2 * per_row_bytes))
    tile_m = max(_SUBLANE,
                 min(max_tile_m,
                     _round_up(n, _SUBLANE),
                     (tile_cap // _SUBLANE) * _SUBLANE))
    n_pad = _round_up(n, tile_m)

    # ---- fold intercept into the matmul --------------------------------
    # x_aug: [N_pad, F+1]  (trailing ones column; padded rows are zeros)
    x_aug = jnp.concatenate(
        [x.astype(jnp.float32), jnp.ones((n, 1), jnp.float32)], axis=1)
    if n_pad != n:
        x_aug = jnp.pad(x_aug, ((0, n_pad - n), (0, 0)))

    # W_aug: [F+1, C_pad]; real classes get (w, b), padded classes get
    # weight 0 and bias -1e30 so exp(logit - max) underflows to exactly 0.
    w_aug = jnp.zeros((f + 1, c_pad), jnp.float32)
    w_aug = w_aug.at[:f, :c].set(w.astype(jnp.float32))
    bias_row = jnp.full((c_pad,), _NEG_BIG, jnp.float32)
    bias_row = bias_row.at[:c].set(b.astype(jnp.float32))
    w_aug = w_aug.at[f, :].set(bias_row)

    grid = (n_pad // tile_m,)
    cost = pl.CostEstimate(
        flops=2 * n_pad * (f + 1) * c_pad,
        transcendentals=n_pad * c_pad + n_pad,           # exp per logit + log per row
        bytes_accessed=4 * (n_pad * (f + 1) + (f + 1) * c_pad + n_pad * c_pad),
    )

    out = pl.pallas_call(
        _sk_log_proba_kernel,
        out_shape=jax.ShapeDtypeStruct((n_pad, c_pad), jnp.float32),
        grid=grid,
        in_specs=[
            pl.BlockSpec((tile_m, f + 1), lambda i: (i, 0)),   # x row tile
            pl.BlockSpec((f + 1, c_pad), lambda i: (0, 0)),    # full W (grid-invariant)
        ],
        out_specs=pl.BlockSpec((tile_m, c_pad), lambda i: (i, 0)),
        compiler_params=pltpu.CompilerParams(
            dimension_semantics=("parallel",),   # shards rows across 2 TCs on v7x
            vmem_limit_bytes=vmem_budget,
        ),
        cost_estimate=cost,
    )(x_aug, w_aug)

    # strip row padding and class padding
    return out[:n, :c]


def reference_forward(x, w, b):
    logits = x @ w + b
    return jax.nn.log_softmax(logits, axis=-1)


if __name__ == "__main__":
    key = jax.random.PRNGKey(0)
    kx, ky, kw, kb = jax.random.split(key, 4)

    # small shapes; N deliberately not a multiple of 8 and C << 128 to
    # exercise both the row-padding and the lane-dense class-padding paths.
    N, F, C = 20, 32, 5   # batch, features, output_dim (classes)

    x = jax.random.normal(kx, (N, F), dtype=jnp.float32)
    y = jax.random.randint(ky, (N,), 0, C, dtype=jnp.int32)

    # deterministic "fitted" classifier parameters (synthetic, not a checkpoint)
    w = 0.1 * jax.random.normal(kw, (F, C), dtype=jnp.float32)
    b = 0.01 * jax.random.normal(kb, (C,), dtype=jnp.float32)

    out = sk_interface_forward(x, y, w, b)
    out = jax.block_until_ready(out)

    ref = reference_forward(x, w, b)
    assert out.shape == (N, C)
    assert jnp.allclose(out, ref, atol=1e-5, rtol=1e-5), "mismatch vs reference"
    # rows of exp(out) must sum to 1 (valid log-probabilities)
    assert jnp.allclose(jnp.exp(out).sum(axis=-1), 1.0, atol=1e-5)

    print("KERNEL_OK")
</pallas_src>

<mosaic_0001>
module attributes {stable_mosaic.version = 11 : i64} {
  func.func @_sk_log_proba_kernel(%arg0: i32, %arg1: memref<24x33xf32, #tpu.memory_space<vmem>>, %arg2: memref<33x128xf32, #tpu.memory_space<vmem>>, %arg3: memref<24x128xf32, #tpu.memory_space<vmem>>) attributes {dimension_semantics = [#tpu.dimension_semantics<parallel>], iteration_bounds = array<i64: 1>, scalar_prefetch = 0 : i64, scratch_operands = 0 : i64, tpu.core_type = #tpu.core_type<tc>, window_params = [{transform_indices = @transform_0, window_bounds = array<i64: 24, 33>}, {pipeline_mode = #tpu.pipeline_mode<synchronous>, transform_indices = @transform_1, window_bounds = array<i64: 33, 128>}, {transform_indices = @transform_2, window_bounds = array<i64: 24, 128>}]} {
    %c0 = arith.constant 0 : index
    %c0_0 = arith.constant 0 : index
    %0 = vector.load %arg1[%c0, %c0_0] : memref<24x33xf32, #tpu.memory_space<vmem>>, vector<24x33xf32>
    %c0_1 = arith.constant 0 : index
    %c0_2 = arith.constant 0 : index
    %1 = vector.load %arg2[%c0_1, %c0_2] : memref<33x128xf32, #tpu.memory_space<vmem>>, vector<33x128xf32>
    %cst = arith.constant dense<0.000000e+00> : vector<24x128xf32>
    %2 = tpu.matmul %0, %1, %cst {dimension_numbers = #tpu.dot_dimension_numbers<[1], [0], [0], [1], [0, 0, 1, 1], [], []>} : vector<24x33xf32>, vector<33x128xf32>, vector<24x128xf32> -> vector<24x128xf32>
    %cst_3 = arith.constant dense<0xFF800000> : vector<24xf32>
    %3 = vector.multi_reduction <maximumf>, %2, %cst_3 [1] : vector<24x128xf32> to vector<24xf32>
    %4 = vector.shape_cast %3 : vector<24xf32> to vector<24x1xf32>
    %5 = vector.broadcast %4 : vector<24x1xf32> to vector<24x128xf32>
    %6 = arith.subf %2, %5 : vector<24x128xf32>
    %7 = math.exp %6 : vector<24x128xf32>
    %cst_4 = arith.constant dense<0.000000e+00> : vector<24xf32>
    %8 = vector.multi_reduction <add>, %7, %cst_4 [1] : vector<24x128xf32> to vector<24xf32>
    %9 = vector.shape_cast %8 : vector<24xf32> to vector<24x1xf32>
    %10 = math.log %9 : vector<24x1xf32>
    %11 = arith.addf %4, %10 : vector<24x1xf32>
    %12 = vector.broadcast %11 : vector<24x1xf32> to vector<24x128xf32>
    %13 = arith.subf %2, %12 : vector<24x128xf32>
    %c0_5 = arith.constant 0 : index
    %c0_6 = arith.constant 0 : index
    %14 = vector.load %arg3[%c0_5, %c0_6] : memref<24x128xf32, #tpu.memory_space<vmem>>, vector<24x128xf32>
    tpu.vector_store %arg3[%c0_5, %c0_6], %13 {strides = array<i32>} : memref<24x128xf32, #tpu.memory_space<vmem>>, vector<24x128xf32>,
    return
  }
  func.func @transform_0(%arg0: i32) -> (i32, i32) {
    %c0_i32 = arith.constant 0 : i32
    %c0_i32_0 = arith.constant 0 : i32
    return %arg0, %c0_i32 : i32, i32
  }
  func.func @transform_1(%arg0: i32) -> (i32, i32) {
    %c0_i32 = arith.constant 0 : i32
    %c0_i32_0 = arith.constant 0 : i32
    %c0_i32_1 = arith.constant 0 : i32
    return %c0_i32, %c0_i32_0 : i32, i32
  }
  func.func @transform_2(%arg0: i32) -> (i32, i32) {
    %c0_i32 = arith.constant 0 : i32
    %c0_i32_0 = arith.constant 0 : i32
    return %arg0, %c0_i32 : i32, i32
  }
}

</mosaic_0001>

<bundles_post_ra>
// kernel: sk_interface_forward.1
= control target key start
LH: loop header
LB: loop body
LE: loop exit
PB: predicated region body
PF: predicated region fallthrough
CT: control target
= control target key end

     0   :  { %vm29_vm0 = vcmask 1040384   ;;  %vm19_vm1 = vcmask 269312   ;;  %s173_s1 = inlined_call_operand.vmem [shape: f32[33,128], index: 1, kind: input, shape index: {}]   ;;  %s174_s0 = inlined_call_operand.vmem [shape: f32[24,33], index: 0, kind: input, shape index: {}]   ;;  %s175_s2 = inlined_call_operand.vmem [shape: f32[24,128], index: 2, kind: output, shape index: {}]  }
   0x1   :  { %v18_v0 = vld [vmem:[%s173_s1 + $0x20] sm:$0x1]  ;;  %v17_v1 = vld [vmem:[%s173_s1 + $0x18] sm:$0xff]  ;;  %v16_v2 = vld [vmem:[%s173_s1 + $0x10] sm:$0xff] }
   0x2   :  { %99 = vmatpush.msk.msra.mxu0 %vm29_vm0, %v18_v0  ;;  %104 = vmatpush.msk.msra.mxu2 %vm29_vm0, %v18_v0  ;;  %v15_v3 = vld [vmem:[%s173_s1 + $0x8] sm:$0xff]  ;;  %v14_v4 = vld [vmem:[%s173_s1] sm:$0xff]  ;;  %v13_v6 = vld [vmem:[%s174_s0 + $0x10] sm:$0xff] }
   0x3   :  { %103 = vmatpush.msk.msra.mxu1 %vm29_vm0, %v18_v0  ;;  %v11_v5 = vld [vmem:[%s174_s0] sm:$0xff]  ;;  %v12_v7 = vld [vmem:[%s174_s0 + $0x8] sm:$0xff] }
   0x4   :  { %45 = vmatpush.msra.mxu0 %v17_v1  ;;  %106 = vmatpush.msra.mxu2 %v17_v1 }
   0x5   :  { %105 = vmatpush.msra.mxu1 %v17_v1 }
   0x6   :  { %46 = vmatpush.msra.mxu0 %v16_v2  ;;  %108 = vmatpush.msra.mxu2 %v16_v2 }
   0x7   :  { %107 = vmatpush.msra.mxu1 %v16_v2 }
   0x8   :  { %47 = vmatpush.msra.mxu0 %v15_v3  ;;  %110 = vmatpush.msra.mxu2 %v15_v3 }
   0x9   :  { %109 = vmatpush.msra.mxu1 %v15_v3 }
   0xa   :  { %48 = vmatpush.msra.mxu0 %v14_v4  ;;  %112 = vmatpush.msra.mxu2 %v14_v4 }
   0xb   :  { %100 = vmatmul.msk.f32.vlgmr.msra.gmra.mxu0 %vm19_vm1, %v11_v5  ;;  %102 = vmatmul.msk.f32.vlgmr.msra.gmra.mxu2 %vm19_vm1, %v13_v6 }
   0xc   :  { %111 = vmatpush.msra.mxu1 %v14_v4 }
   0xd   :  { %101 = vmatmul.msk.f32.vlgmr.msra.gmra.mxu1 %vm19_vm1, %v12_v7 }
  0x88   :  { %v50_v8 = vpop.f32.mrf.mxu0 }
  0x89   :  { %59 = vmax.xlane.f32.xlu0 %v50_v8 }
  0x8a   :  { %v53_v10 = vpop.f32.mrf.mxu1 }
  0x8e   :  { %v56_v9 = vpop.f32.mrf.mxu2 }
  0x8f   :  { %63 = vmax.xlane.f32.xlu1 %v56_v9 }
  0x91   :  { %61 = vmax.xlane.f32.xlu0 %v53_v10 }
  0xfc   :  { %v60_v11 = vpop.xlane.xlu0 %59 }
  0xfd   :  { %v65_v12 = vsub.f32 %v50_v8, %v60_v11 }
  0xff   :  { %v68_v13 = vmul.f32 1.442695, %v65_v12 }
 0x101   :  { %113 = vpow2.f32 %v68_v13 }
 0x102   :  { %v64_v16 = vpop.xlane.xlu1 %63 }
 0x103   :  { %v67_v19 = vsub.f32 %v56_v9, %v64_v16 }
 0x104   :  { %v62_v14 = vpop.xlane.xlu0 %61 }
 0x105   :  { %v66_v15 = vsub.f32 %v53_v10, %v62_v14  ;;  %v72_v20 = vmul.f32 1.442695, %v67_v19 }
 0x107   :  { %v114_v17 = vpop.eup %113  ;;  %v70_v18 = vmul.f32 1.442695, %v66_v15 }
 0x108   :  { %74 = vadd.xlane.f32.xlu1 %v114_v17 }
 0x109   :  { %115 = vpow2.f32 %v70_v18 }
 0x10a   :  { %117 = vpow2.f32 %v72_v20 }
 0x10f   :  { %v116_v21 = vpop.eup %115 }
 0x110   :  { %76 = vadd.xlane.f32.xlu2 %v116_v21  ;;  %v118_v22 = vpop.eup %117 }
 0x118   :  { %78 = vadd.xlane.f32.xlu2 %v118_v22 }
 0x17b   :  { %v75_v23 = vpop.xlane.xlu1 %74 }
 0x17c   :  { %119 = vlog2.f32 %v75_v23 }
 0x182   :  { %v120_v24 = vpop.eup %119 }
 0x183   :  { %v81_v25 = vmul.f32 0.6931472, %v120_v24  ;;  %v77_v26 = vpop.xlane.xlu2 %76 }
 0x184   :  { %121 = vlog2.f32 %v77_v26 }
 0x185   :  { %v86_v27 = vadd.f32 %v81_v25, %v60_v11 }
 0x187   :  { %v89_v28 = vsub.f32 %v50_v8, %v86_v27 }
 0x189   :  { %92 = vst [vmem:[%s175_s2] sm:$0xff] %v89_v28 }
 0x18a   :  { %v122_v29 = vpop.eup %121 }
 0x18b   :  { %v83_v30 = vmul.f32 0.6931472, %v122_v29  ;;  %v79_v31 = vpop.xlane.xlu2 %78 }
 0x18c   :  { %123 = vlog2.f32 %v79_v31 }
 0x18d   :  { %v87_v32 = vadd.f32 %v83_v30, %v62_v14 }
 0x18f   :  { %v90_v33 = vsub.f32 %v53_v10, %v87_v32 }
 0x191   :  { %93 = vst [vmem:[%s175_s2 + $0x8] sm:$0xff] %v90_v33 }
 0x192   :  { %v124_v34 = vpop.eup %123 }
 0x193   :  { %v85_v35 = vmul.f32 0.6931472, %v124_v34 }
 0x195   :  { %v88_v36 = vadd.f32 %v85_v35, %v64_v16 }
 0x197   :  { %v91_v37 = vsub.f32 %v56_v9, %v88_v36 }
 0x199   :  { %94 = vst [vmem:[%s175_s2 + $0x10] sm:$0xff] %v91_v37 }

</bundles_post_ra>
